<compile_context>
chip_gen: v7x
topology: tpu7x:2x2x1
jax: 0.10.0
libtpu: 0.0.40
codegen_flags: <defaults>
</compile_context>

<pallas_src>
import jax
import jax.numpy as jnp
from jax.experimental import pallas as pl
from jax.experimental.pallas import tpu as pltpu

# Problem sizes (small, consistent with the module's forward).
N = 2                 # batch
CIN = 4               # input channels
COUT = 8              # backbone output channels
H = W = 16            # spatial
KH = KW = 3           # conv kernel
PAD = 1
NUM_CLASSES = 10
HW = H * W            # 256  (multiple of 128 -> lane-tile-aligned pooling)
NHW = N * H * W       # 512
KTOT = KH * KW * CIN + 1          # 36 conv taps*cin + 1 bias row = 37
KPAD = 40                         # contraction dim padded to a multiple of 8

_HIGHEST = jax.lax.Precision.HIGHEST


def fullmodel_kernel(p_ref, params_ref, o_ref):
    # p_ref      : (KPAD, NHW)   im2col patches^T (conv-bias ones-row folded in)
    # params_ref : (18, KPAD)    packed params:
    #                rows 0..7          -> conv weight  (COUT, KPAD)
    #                rows 8..17, 0..7   -> tail weight^T (NUM_CLASSES, COUT)
    #                rows 8..17, 8      -> tail bias column
    # o_ref      : (NUM_CLASSES, N)  logits^T
    wc = params_ref[0:COUT, :]                                    # (8, 40)

    # Conv (+bias) as one MXU matmul; activations are lane-dense (8, 512).
    y = jnp.dot(wc, p_ref[...],
                precision=_HIGHEST, preferred_element_type=jnp.float32)
    y = jnp.maximum(y, 0.0)                                       # ReLU

    # Global average pool per batch element: lane-tile-aligned XLU reductions
    # (HW = 256 is a multiple of 128), exact f32 — no pooling matmul needed.
    cols = [jnp.sum(y[:, b * HW:(b + 1) * HW], axis=1, keepdims=True)
            for b in range(N)]
    pooled = jnp.concatenate(cols, axis=1) * (1.0 / HW)           # (COUT, N)

    # Tail Linear (weight + bias carved from the packed params slab).
    wt_t = params_ref[COUT:COUT + NUM_CLASSES, 0:COUT]            # (10, 8)
    bt = params_ref[COUT:COUT + NUM_CLASSES, COUT:COUT + 1]       # (10, 1)
    o_ref[...] = jnp.dot(wt_t, pooled,
                         precision=_HIGHEST,
                         preferred_element_type=jnp.float32) + bt


def full_model(x_nchw, conv_w_hwio, conv_b, tail_w, tail_b):
    f32 = jnp.float32

    # ---- Patch matrix, built directly transposed (lane-dense (KPAD, NHW)). ----
    xp = jnp.pad(x_nchw.astype(f32), ((0, 0), (0, 0), (PAD, PAD), (PAD, PAD)))
    xc = jnp.transpose(xp, (1, 0, 2, 3))                  # (CIN, N, H+2, W+2)
    taps = [xc[:, :, dy:dy + H, dx:dx + W].reshape(CIN, NHW)
            for dy in range(KH) for dx in range(KW)]      # 9 x (CIN, NHW)
    patches = jnp.concatenate(taps + [jnp.ones((1, NHW), f32)], axis=0)  # (37, 512)
    patches = jnp.pad(patches, ((0, KPAD - KTOT), (0, 0)))               # (40, 512)

    # ---- Single packed parameter slab (one DMA for all small operands). ----
    w_flat = conv_w_hwio.reshape(KH * KW * CIN, COUT).astype(f32)        # (36, 8)
    w_aug = jnp.concatenate([w_flat, conv_b.reshape(1, COUT).astype(f32)],
                            axis=0)                                      # (37, 8)
    w_aug = jnp.pad(w_aug, ((0, KPAD - KTOT), (0, 0)))                   # (40, 8)
    wc = w_aug.T                                                         # (8, 40)

    tail_blk = jnp.concatenate(
        [tail_w.T.astype(f32), tail_b.reshape(NUM_CLASSES, 1).astype(f32)],
        axis=1)                                                          # (10, 9)
    tail_blk = jnp.pad(tail_blk, ((0, 0), (0, KPAD - (COUT + 1))))       # (10, 40)

    params = jnp.concatenate([wc, tail_blk], axis=0)                     # (18, 40)

    # ---- Single-step Pallas kernel: everything fits in VMEM, no grid. ----
    out_t = pl.pallas_call(
        fullmodel_kernel,
        out_shape=jax.ShapeDtypeStruct((NUM_CLASSES, N), jnp.float32),
        in_specs=[pl.BlockSpec(memory_space=pltpu.MemorySpace.VMEM)] * 2,
        out_specs=pl.BlockSpec(memory_space=pltpu.MemorySpace.VMEM),
    )(patches, params)
    return out_t.T                                                       # (N, NUM_CLASSES)


def reference(x_nchw, conv_w_hwio, conv_b, tail_w, tail_b):
    # Pure-JAX reference of the same forward pass (for correctness check).
    x = jnp.transpose(x_nchw, (0, 2, 3, 1))
    y = jax.lax.conv_general_dilated(
        x, conv_w_hwio, window_strides=(1, 1),
        padding=((PAD, PAD), (PAD, PAD)),
        dimension_numbers=("NHWC", "HWIO", "NHWC"),
        precision=_HIGHEST)
    y = jnp.maximum(y + conv_b[None, None, None, :], 0.0)
    pooled = jnp.mean(y, axis=(1, 2))                    # (N, COUT)
    return jnp.dot(pooled, tail_w, precision=_HIGHEST) + tail_b[None, :]


if __name__ == "__main__":
    key = jax.random.PRNGKey(0)
    kx, kw, kb, ktw, ktb = jax.random.split(key, 5)

    # Deterministic synthetic inputs/parameters.
    x = jax.random.normal(kx, (N, CIN, H, W), dtype=jnp.float32)            # NCHW
    conv_w = jax.random.normal(kw, (KH, KW, CIN, COUT), jnp.float32) * 0.1  # HWIO
    conv_b = jax.random.normal(kb, (COUT,), jnp.float32) * 0.1
    tail_w = jax.random.normal(ktw, (COUT, NUM_CLASSES), jnp.float32) * 0.1
    tail_b = jax.random.normal(ktb, (NUM_CLASSES,), jnp.float32) * 0.1

    out = full_model(x, conv_w, conv_b, tail_w, tail_b)
    out = jax.block_until_ready(out)

    ref = reference(x, conv_w, conv_b, tail_w, tail_b)
    assert out.shape == (N, NUM_CLASSES)
    assert jnp.allclose(out, ref, atol=1e-3, rtol=1e-3), (out, ref)

    print("KERNEL_OK")
</pallas_src>

<mosaic_0001>
module attributes {stable_mosaic.version = 11 : i64} {
  func.func @fullmodel_kernel(%arg0: memref<40x512xf32, #tpu.memory_space<vmem>>, %arg1: memref<18x40xf32, #tpu.memory_space<vmem>>, %arg2: memref<10x2xf32, #tpu.memory_space<vmem>>) attributes {dimension_semantics = [], scalar_prefetch = 0 : i64, scratch_operands = 0 : i64, tpu.core_type = #tpu.core_type<tc>} {
    %c0 = arith.constant 0 : index
    %c0_0 = arith.constant 0 : index
    %0 = vector.load %arg1[%c0, %c0_0] : memref<18x40xf32, #tpu.memory_space<vmem>>, vector<8x40xf32>
    %c0_1 = arith.constant 0 : index
    %c0_2 = arith.constant 0 : index
    %1 = vector.load %arg0[%c0_1, %c0_2] : memref<40x512xf32, #tpu.memory_space<vmem>>, vector<40x512xf32>
    %cst = arith.constant dense<0.000000e+00> : vector<8x512xf32>
    %2 = tpu.matmul %0, %1, %cst {dimension_numbers = #tpu.dot_dimension_numbers<[1], [0], [0], [1], [0, 0, 1, 1], [], []>, precision = #tpu.contract_precision<fp32>} : vector<8x40xf32>, vector<40x512xf32>, vector<8x512xf32> -> vector<8x512xf32>
    %cst_3 = arith.constant 0.000000e+00 : f32
    %3 = vector.broadcast %cst_3 : f32 to vector<8x512xf32>
    %4 = arith.maximumf %2, %3 : vector<8x512xf32>
    %5 = vector.extract_strided_slice %4 {offsets = [0, 0], sizes = [8, 256], strides = [1, 1]} : vector<8x512xf32> to vector<8x256xf32>
    %cst_4 = arith.constant dense<0.000000e+00> : vector<8xf32>
    %6 = vector.multi_reduction <add>, %5, %cst_4 [1] : vector<8x256xf32> to vector<8xf32>
    %7 = vector.shape_cast %6 : vector<8xf32> to vector<8x1xf32>
    %8 = vector.extract_strided_slice %4 {offsets = [0, 256], sizes = [8, 256], strides = [1, 1]} : vector<8x512xf32> to vector<8x256xf32>
    %cst_5 = arith.constant dense<0.000000e+00> : vector<8xf32>
    %9 = vector.multi_reduction <add>, %8, %cst_5 [1] : vector<8x256xf32> to vector<8xf32>
    %10 = vector.shape_cast %9 : vector<8xf32> to vector<8x1xf32>
    %11 = tpu.concatenate %7, %10 in 1 : vector<8x1xf32>, vector<8x1xf32> -> vector<8x2xf32>
    %cst_6 = arith.constant 3.906250e-03 : f32
    %12 = vector.broadcast %cst_6 : f32 to vector<8x2xf32>
    %13 = arith.mulf %11, %12 : vector<8x2xf32>
    %c8 = arith.constant 8 : index
    %c0_7 = arith.constant 0 : index
    %14 = vector.load %arg1[%c8, %c0_7] : memref<18x40xf32, #tpu.memory_space<vmem>>, vector<10x8xf32>
    %c8_8 = arith.constant 8 : index
    %c8_9 = arith.constant 8 : index
    %15 = vector.load %arg1[%c8_8, %c8_9] : memref<18x40xf32, #tpu.memory_space<vmem>>, vector<10x1xf32>
    %cst_10 = arith.constant dense<0.000000e+00> : vector<10x2xf32>
    %16 = tpu.matmul %14, %13, %cst_10 {dimension_numbers = #tpu.dot_dimension_numbers<[1], [0], [0], [1], [0, 0, 1, 1], [], []>, precision = #tpu.contract_precision<fp32>} : vector<10x8xf32>, vector<8x2xf32>, vector<10x2xf32> -> vector<10x2xf32>
    %17 = vector.broadcast %15 : vector<10x1xf32> to vector<10x2xf32>
    %18 = arith.addf %16, %17 : vector<10x2xf32>
    %c0_11 = arith.constant 0 : index
    %c0_12 = arith.constant 0 : index
    %19 = vector.load %arg2[%c0_11, %c0_12] : memref<10x2xf32, #tpu.memory_space<vmem>>, vector<10x2xf32>
    tpu.vector_store %arg2[%c0_11, %c0_12], %18 {strides = array<i32>} : memref<10x2xf32, #tpu.memory_space<vmem>>, vector<10x2xf32>,
    return
  }
}

</mosaic_0001>

<bundles_post_ra>
// kernel: tpu_custom_call.1
= control target key start
LH: loop header
LB: loop body
LE: loop exit
PB: predicated region body
PF: predicated region fallthrough
CT: control target
= control target key end

     0   :  { %7 = vsyncpa [#allocation3], 0  ;;  %s2307_s0 = inlined_call_operand.hbm [shape: f32[40,512], index: 0, kind: input, shape index: {}]   ;;  %s2308_s1 = inlined_call_operand.hbm [shape: f32[18,40], index: 1, kind: input, shape index: {}]   ;;  %s2309_s2 = inlined_call_operand.vmem [shape: f32[10,2], index: 2, kind: output, shape index: {}]  }
   0x1   :  { %8 = vsyncpa [#allocation5], 0  ;;  %s1965_s9 = smov [#allocation2]   ;;  %s1917_s13 = scalar_lea.hbm %s2307_s0, 2560 }
   0x2   :  { %s14_s10 = sshll.u32 %s1965_s9, 4  ;;  %p1918_p0 = scmp.ne.s32.totalorder %s2307_s0, %s1917_s13  ;;  %s15_s10 = int_to_ptr.vmem [resolvable:$true] %s14_s10 }
   0x3   :  { %p1921_p1 = scmp.lt.u32.totalorder %s1917_s13, %s2307_s0 }
   0x5   :  { %p1923_p2 = pnand %p1921_p1, %p1918_p0 }
   0x7   :  { %1926 = shalt.err (!%p1923_p2)
}
   0x8   :  { %s1927_s18 = scalar_lea.vmem %s15_s10, 2560  ;;  %p1932_p4 = scmp.lt.s32.totalorder %s15_s10, %s15_s10 }
   0x9   :  { %p1928_p3 = scmp.ne.s32.totalorder %s15_s10, %s1927_s18  ;;  %p1933_p5 = scmp.lt.s32.totalorder %s1927_s18, %s1927_s18 }
   0xb   :  { %p1934_p6 = por %p1933_p5, %p1932_p4 }
   0xd   :  { %p1935_p7 = pnand %p1934_p6, %p1928_p3 }
   0xf   :  { %1938 = shalt.err (!%p1935_p7)
}
  0x10   :  { %s1966_s19 = smov 512   ;;  %s1967_s20 = smov 32  }
  0x11   :  { %20 = dma.hbm_to_vmem [thread:$0]  %s2307_s0, 2560, %s15_s10, [#allocation3], %s1966_s19, %s1966_s19, %s1967_s20  }
  0x12   :  { %s1968_s23 = smov [#allocation4]   ;;  %s1939_s27 = scalar_lea.hbm %s2308_s1, 384 }
  0x13   :  { %s26_s24 = sshll.u32 %s1968_s23, 4  ;;  %p1940_p8 = scmp.ne.s32.totalorder %s2308_s1, %s1939_s27  ;;  %s27_s24 = int_to_ptr.vmem [resolvable:$true] %s26_s24 }
  0x14   :  { %p1943_p9 = scmp.lt.u32.totalorder %s1939_s27, %s2308_s1 }
  0x16   :  { %p1945_p10 = pnand %p1943_p9, %p1940_p8 }
  0x18   :  { %1948 = shalt.err (!%p1945_p10)
}
  0x19   :  { %s1949_s4 = scalar_lea.vmem %s27_s24, 384  ;;  %p1954_p12 = scmp.lt.s32.totalorder %s27_s24, %s27_s24 }
  0x1a   :  { %p1950_p11 = scmp.ne.s32.totalorder %s27_s24, %s1949_s4  ;;  %p1955_p13 = scmp.lt.s32.totalorder %s1949_s4, %s1949_s4 }
  0x1c   :  { %p1956_p0 = por %p1955_p13, %p1954_p12 }
  0x1e   :  { %p1957_p1 = pnand %p1956_p0, %p1950_p11 }
  0x20   :  { %1960 = shalt.err (!%p1957_p1)
}
  0x21   :  { %s1969_s0 = smov 128   ;;  %s1970_s5 = smov 8  }
  0x22   :  { %32 = dma.hbm_to_vmem [thread:$0]  %s2308_s1, 384, %s27_s24, [#allocation5], %s1969_s0, %s1969_s0, %s1970_s5  }
  0x23   :  { %1961 = dma.done.wait [#allocation3], 2560  }
  0x24   :  { %1962 = vsyncadd [#allocation3], 4294964736 }
  0x25   :  { %1963 = dma.done.wait [#allocation5], 384  }
  0x26   :  { %1964 = vsyncadd [#allocation5], 4294966912  ;;  %v1971_v0 = vmov 0.0   ;;  %v41_v1 = vld [vmem:[#allocation2 + $0x8] sm:$0xff]  ;;  %v40_v3 = vld [vmem:[#allocation2] sm:$0xff]  ;;  %vm60_vm0 = vcmask 326656  }
  0x27   :  { %138 = vmatprep.mubr.f32.mxu1 %v1971_v0  ;;  %264 = vmatprep.mubr.f32.mxu0 %v1971_v0  ;;  %v45_v2 = vld [vmem:[#allocation2 + $0x28] sm:$0xff]  ;;  %v64_v4 = vand.u32 4294901760, %v41_v1  ;;  %v44_v6 = vld [vmem:[#allocation2 + $0x20] sm:$0xff]  ;;  %v66_v7 = vand.u32 4294901760, %v40_v3  ;;  %v43_v24 = vld [vmem:[#allocation2 + $0x18] sm:$0xff]  ;;  %vm1227_vm1 = vcmask 64512  }
  0x28   :  { %v68_v5 = vand.u32 4294901760, %v45_v2  ;;  %v49_v8 = vld [vmem:[#allocation2 + $0x48] sm:$0xff]  ;;  %v70_v10 = vand.u32 4294901760, %v44_v6  ;;  %v48_v13 = vld [vmem:[#allocation2 + $0x40] sm:$0xff]  ;;  %v47_v29 = vld [vmem:[#allocation2 + $0x38] sm:$0xff]  ;;  %v633_v39 = vand.u32 4294901760, %v43_v24 }
  0x29   :  { %v53_v9 = vld [vmem:[#allocation2 + $0x68] sm:$0xff]  ;;  %v72_v11 = vand.u32 4294901760, %v49_v8  ;;  %v52_v14 = vld [vmem:[#allocation2 + $0x60] sm:$0xff]  ;;  %v2016_v16 = vsub.f32 %v40_v3, %v66_v7  ;;  %v74_v17 = vand.u32 4294901760, %v48_v13  ;;  %v2041_v32 = vsub.f32 %v41_v1, %v64_v4  ;;  %v42_v35 = vld [vmem:[#allocation2 + $0x10] sm:$0xff] }
  0x2a   :  { %v76_v12 = vand.u32 4294901760, %v53_v9  ;;  %v2014_v15 = vpack.c.bf16 %v68_v5, %v64_v4  ;;  %v78_v18 = vand.u32 4294901760, %v52_v14  ;;  %v2018_v19 = vld [vmem:[#allocation2 + $0x88] sm:$0xff]  ;;  %v2020_v20 = vpack.c.bf16 %v70_v10, %v66_v7  ;;  %v39_v23 = vld [vmem:[#allocation4] sm:$0xff]  ;;  %v46_v44 = vld [vmem:[#allocation2 + $0x30] sm:$0xff] }
  0x2b   :  { %v2022_v21 = vsub.f32 %v44_v6, %v70_v10  ;;  %v2027_v25 = vsub.f32 %v49_v8, %v72_v11  ;;  %v2033_v28 = vsub.f32 %v48_v13, %v74_v17  ;;  %v2039_v31 = vand.u32 4294901760, %v2018_v19  ;;  %v2045_v34 = vld [vmem:[#allocation2 + $0x80] sm:$0xff]  ;;  %v51_v61 = vld [vmem:[#allocation2 + $0x58] sm:$0xff]  ;;  %v50_v4 = vld [vmem:[#allocation2 + $0x50] sm:$0xff] }
  0x2c   :  { %v2024_v22 = vpack.c.bf16 %v76_v12, %v72_v11  ;;  %1780 = vmatprep.subr.bf16.mxu1 %v2014_v15  ;;  %v2029_v26 = vsub.f32 %v53_v9, %v76_v12  ;;  %v2031_v27 = vpack.c.bf16 %v78_v18, %v74_v17  ;;  %v2036_v30 = vsub.f32 %v52_v14, %v78_v18  ;;  %v55_v62 = vld [vmem:[#allocation2 + $0x78] sm:$0xff]  ;;  %v54_v13 = vld [vmem:[#allocation2 + $0x70] sm:$0xff] }
  0x2d   :  { %1782 = vmatpush1.bf16.msra.mxu1 %v2020_v20  ;;  %v2043_v33 = vsub.f32 %v45_v2, %v68_v5  ;;  %v158_v36 = vand.u32 4294901760, %v2016_v16  ;;  %v170_v37 = vand.u32 4294901760, %v2022_v21  ;;  %v62_v38 = vsel %vm60_vm0, %v39_v23, 0 }
  0x2e   :  { %1784 = vmatprep.subr.bf16.mxu1 %v2024_v22  ;;  %v152_v40 = vand.u32 4294901760, %v2041_v32  ;;  %v2053_v42 = vand.u32 4294901760, %v62_v38  ;;  %v637_v43 = vand.u32 4294901760, %v47_v29  ;;  %v2056_v45 = vand.u32 4294901760, %v2045_v34 }
  0x2f   :  { %v164_v41 = vand.u32 4294901760, %v2043_v33  ;;  %v159_v46 = vsub.f32 %v2016_v16, %v158_v36  ;;  %v171_v47 = vsub.f32 %v2022_v21, %v170_v37  ;;  %v635_v48 = vand.u32 4294901760, %v42_v35 }
  0x30   :  { %v153_v49 = vsub.f32 %v2041_v32, %v152_v40  ;;  %v2072_v51 = vsub.f32 %v62_v38, %v2053_v42  ;;  %v2074_v52 = vsub.f32 %v43_v24, %v633_v39  ;;  %v2077_v55 = vpack.c.bf16 %v637_v43, %v633_v39 }
  0x31   :  { %1786 = vmatpush1.bf16.msra.mxu1 %v2031_v27  ;;  %v165_v50 = vsub.f32 %v2043_v33, %v164_v41  ;;  %v160_v53 = vand.u32 4294901760, %v159_v46  ;;  %v172_v54 = vand.u32 4294901760, %v171_v47  ;;  %v639_v56 = vand.u32 4294901760, %v46_v44 }
  0x32   :  { %81 = vmatprep.subr.mxu1 %v2039_v31  ;;  %v154_v57 = vand.u32 4294901760, %v153_v49  ;;  %v2080_v59 = vand.u32 4294901760, %v2072_v51  ;;  %v2082_v60 = vsub.f32 %v47_v29, %v637_v43  ;;  %v2086_v2 = vsub.f32 %v42_v35, %v635_v48 }
  0x33   :  { %v166_v58 = vand.u32 4294901760, %v165_v50  ;;  %v1789_v63 = vpack.c.bf16 %v172_v54, %v160_v53  ;;  %v2084_v1 = vpack.c.bf16 %v639_v56, %v635_v48  ;;  %v176_v3 = vand.u32 4294901760, %v2027_v25  ;;  %v59_v48 = vld [vmem:[#allocation2 + $0x98] sm:$0xff]  ;;  %v58_v54 = vld [vmem:[#allocation2 + $0x90] sm:$0xff] }
  0x34   :  { %v142_v6 = vsub.f32 %v2072_v51, %v2080_v59  ;;  %v188_v7 = vand.u32 4294901760, %v2029_v26  ;;  %v182_v8 = vand.u32 4294901760, %v2033_v28  ;;  %v194_v10 = vand.u32 4294901760, %v2036_v30 }
  0x35   :  { %v1787_v5 = vpack.c.bf16 %v166_v58, %v154_v57  ;;  %83 = vmatpush1.msra.mxu1 %v2056_v45  ;;  %v177_v9 = vsub.f32 %v2027_v25, %v176_v3  ;;  %v641_v11 = vand.u32 4294901760, %v51_v61  ;;  %v645_v12 = vand.u32 4294901760, %v55_v62 }
  0x36   :  { %1828 = vmatprep.subr.bf16.mxu1 %v2077_v55  ;;  %v2099_v14 = vand.u32 4294901760, %v142_v6  ;;  %v189_v17 = vsub.f32 %v2029_v26, %v188_v7  ;;  %v183_v18 = vsub.f32 %v2033_v28, %v182_v8  ;;  %v643_v23 = vand.u32 4294901760, %v50_v4 }
  0x37   :  { %1788 = vmatprep.subr.bf16.mxu0 %v1787_v5  ;;  %v2107_v24 = vsub.f32 %v46_v44, %v639_v56  ;;  %v178_v29 = vand.u32 4294901760, %v177_v9  ;;  %v195_v35 = vsub.f32 %v2036_v30, %v194_v10  ;;  %v2112_v38 = vpack.c.bf16 %v645_v12, %v641_v11 }
  0x38   :  { %1790 = vmatpush1.bf16.msra.mxu0 %v1789_v63  ;;  %144 = vmatmul.mubr.f32.vlgmr.msra.gmra.mrb[0].mxu1 %v2099_v14  ;;  %v190_v39 = vand.u32 4294901760, %v189_v17  ;;  %v184_v43 = vand.u32 4294901760, %v183_v18  ;;  %v2115_v46 = vsub.f32 %v51_v61, %v641_v11  ;;  %v647_v47 = vand.u32 4294901760, %v54_v13 }
  0x39   :  { %1830 = vmatpush1.bf16.msra.mxu1 %v2084_v1  ;;  %v196_v49 = vand.u32 4294901760, %v195_v35  ;;  %v2118_v44 = vsub.f32 %v55_v62, %v645_v12  ;;  %v2122_v50 = vsub.f32 %v2018_v19, %v2039_v31  ;;  %v2126_v53 = vsub.f32 %v2045_v34, %v2056_v45  ;;  %707 = vmatprep.mubr.f32.mxu1 %v1971_v0 }
  0x3a   :  { %v1791_v56 = vpack.c.bf16 %v190_v39, %v178_v29  ;;  %1832 = vmatprep.subr.bf16.mxu1 %v2112_v38  ;;  %v2130_v57 = vpack.c.bf16 %v647_v47, %v643_v23  ;;  %v2132_v58 = vsub.f32 %v50_v4, %v643_v23  ;;  %v2134_v61 = vsub.f32 %v54_v13, %v647_v47 }
  0x3b   :  { %v1793_v62 = vpack.c.bf16 %v196_v49, %v184_v43  ;;  %v200_v19 = vand.u32 4294901760, %v2122_v50  ;;  %v2310_v63 = vand.u32 4294901760, %v2126_v53  ;;  %v2138_v5 = vand.u32 4294901760, %v59_v48 }
  0x3c   :  { %1792 = vmatprep.subr.bf16.mxu0 %v1791_v56  ;;  %v1795_v34 = vpack.c.bf16 %v2043_v33, %v2041_v32  ;;  %v2142_v6 = vand.u32 4294901760, %v58_v54  ;;  %v2313_v9 = vand.u32 4294901760, %v2074_v52  ;;  %v2311_v4 = vand.u32 4294901760, %v2082_v60 }
  0x3d   :  { %1794 = vmatpush1.bf16.msra.mxu0 %v1793_v62  ;;  %1834 = vmatpush1.bf16.msra.mxu1 %v2130_v57  ;;  %v201_v11 = vsub.f32 %v2122_v50, %v200_v19  ;;  %v207_v12 = vsub.f32 %v2126_v53, %v2310_v63  ;;  %v2312_v13 = vand.u32 4294901760, %v2086_v2  ;;  %v739_v17 = vand.u32 4294901760, %v2107_v24 }
  0x3e   :  { %650 = vmatprep.subr.mxu1 %v2138_v5  ;;  %v1797_v18 = vpack.c.bf16 %v2022_v21, %v2016_v16  ;;  %v2159_v23 = vsub.f32 %v58_v54, %v2142_v6  ;;  %v722_v29 = vsub.f32 %v2074_v52, %v2313_v9  ;;  %v734_v35 = vsub.f32 %v2082_v60, %v2311_v4 }
  0x3f   :  { %v202_v39 = vand.u32 4294901760, %v201_v11  ;;  %v208_v43 = vand.u32 4294901760, %v207_v12  ;;  %v728_v47 = vsub.f32 %v2086_v2, %v2312_v13  ;;  %v740_v49 = vsub.f32 %v2107_v24, %v739_v17 }
  0x40   :  { %v723_v54 = vand.u32 4294901760, %v722_v29  ;;  %v735_v56 = vand.u32 4294901760, %v734_v35  ;;  %v1799_v62 = vpack.c.bf16 %v2029_v26, %v2027_v25  ;;  %v745_v63 = vand.u32 4294901760, %v2115_v46 }
  0x41   :  { %203 = vmatprep.subr.mxu0 %v202_v39  ;;  %652 = vmatpush1.msra.mxu1 %v2142_v6  ;;  %v729_v11 = vand.u32 4294901760, %v728_v47  ;;  %v741_v12 = vand.u32 4294901760, %v740_v49  ;;  %v2314_v4 = vand.u32 4294901760, %v2118_v44  ;;  %v751_v13 = vand.u32 4294901760, %v2132_v58 }
  0x42   :  { %209 = vmatpush1.msra.mxu0 %v208_v43  ;;  %v1835_v9 = vpack.c.bf16 %v735_v56, %v723_v54  ;;  %713 = vmatmul.mubr.f32.vlgmr.msra.gmra.mrb[2].mxu1 %v2099_v14  ;;  %v746_v29 = vsub.f32 %v2115_v46, %v745_v63  ;;  %v2315_v35 = vand.u32 4294901760, %v2134_v61  ;;  %v2185_v39 = vsub.f32 %v59_v48, %v2138_v5 }
  0x43   :  { %1796 = vmatprep.subr.bf16.mxu0 %v1795_v34  ;;  %266 = vmatmul.mubr.f32.vlgmr.msra.gmra.mrb[0].mxu0 %v2053_v42  ;;  %v1837_v47 = vpack.c.bf16 %v741_v12, %v729_v11  ;;  %v758_v43 = vsub.f32 %v2118_v44, %v2314_v4  ;;  %v752_v14 = vsub.f32 %v2132_v58, %v751_v13  ;;  %v775_v49 = vand.u32 4294901760, %v2159_v23 }
  0x44   :  { %1798 = vmatpush1.bf16.msra.mxu0 %v1797_v18  ;;  %1836 = vmatprep.subr.bf16.mxu1 %v1835_v9  ;;  %v1801_v48 = vpack.c.bf16 %v2036_v30, %v2033_v28  ;;  %v747_v54 = vand.u32 4294901760, %v746_v29  ;;  %v764_v34 = vsub.f32 %v2134_v61, %v2315_v35  ;;  %v769_v56 = vand.u32 4294901760, %v2185_v39 }
  0x45   :  { %1838 = vmatpush1.bf16.msra.mxu1 %v1837_v47  ;;  %1800 = vmatprep.subr.bf16.mxu0 %v1799_v62  ;;  %v759_v11 = vand.u32 4294901760, %v758_v43  ;;  %v753_v12 = vand.u32 4294901760, %v752_v14  ;;  %v776_v18 = vsub.f32 %v2159_v23, %v775_v49  ;;  %v1843_v43 = vpack.c.bf16 %v2082_v60, %v2074_v52 }
  0x46   :  { %v765_v4 = vand.u32 4294901760, %v764_v34  ;;  %356 = vmatprep.mubr.f32.mxu0 %v1971_v0  ;;  %v770_v9 = vsub.f32 %v2185_v39, %v769_v56  ;;  %833 = vmatprep.mubr.f32.mxu1 %v1971_v0  ;;  %v1845_v14 = vpack.c.bf16 %v2107_v24, %v2086_v2  ;;  %v1815_v34 = vpack.c.bf16 %v188_v7, %v176_v3  ;;  %v1216_v3 = vld [vmem:[#allocation4 + $0x10] sm:$0x3] }
  0x47   :  { %v1839_v29 = vpack.c.bf16 %v759_v11, %v747_v54  ;;  %v777_v62 = vand.u32 4294901760, %v776_v18  ;;  %v1813_v54 = vpack.c.bf16 %v170_v37, %v158_v36  ;;  %v1817_v16 = vpack.c.bf16 %v194_v10, %v182_v8 }
  0x48   :  { %1802 = vmatpush1.bf16.msra.mxu0 %v1801_v48  ;;  %v1841_v35 = vpack.c.bf16 %v765_v4, %v753_v12  ;;  %v771_v47 = vand.u32 4294901760, %v770_v9  ;;  %v1847_v4 = vpack.c.bf16 %v2118_v44, %v2115_v46  ;;  %v1811_v48 = vpack.c.bf16 %v164_v41, %v152_v40 }
  0x49   :  { %1840 = vmatprep.subr.bf16.mxu1 %v1839_v29  ;;  %298 = vmatprep.subr.mxu0 %v2122_v50  ;;  %v2316_v21 = vand.u32 4294901760, %v2074_v52  ;;  %v2317_v25 = vand.u32 4294901760, %v2082_v60  ;;  %v2318_v28 = vand.u32 4294901760, %v2126_v53  ;;  %v2319_v30 = vand.u32 4294901760, %v2086_v2  ;;  %v1215_v2 = vld [vmem:[#allocation4 + $0x8] sm:$0xff] }
  0x4a   :  { %1842 = vmatpush1.bf16.msra.mxu1 %v1841_v35  ;;  %v1849_v35 = vpack.c.bf16 %v2134_v61, %v2132_v58  ;;  %v2320_v33 = vand.u32 4294901760, %v2118_v44  ;;  %v1230_v7 = vsel %vm1227_vm1, %v1216_v3, 0  ;;  %v1972_v44 = vmov 8  }
  0x4b   :  { %772 = vmatprep.subr.mxu1 %v771_v47  ;;  %v1859_v26 = vpack.c.bf16 %v2317_v25, %v2316_v21  ;;  %v1861_v32 = vpack.c.bf16 %v739_v17, %v2319_v30  ;;  %1915 = vset.pattern.permute.xlu1 %v1972_v44  ;;  %v1308_v50 = vand.u32 4294901760, %v1230_v7  ;;  %vm1212_vm2 = vcmask 7168  }
  0x4c   :  { %301 = vmatpush1.msra.mxu0 %v2126_v53  ;;  %v1863_v36 = vpack.c.bf16 %v2320_v33, %v745_v63  ;;  %1916 = vset.pattern.permute.xlu0 %v1972_v44  ;;  %vm1723_vm3 = vcmask 9216   ;;  %vm1721_vm4 = vcmask 15360  }
  0x4d   :  { %1804 = vmatprep.subr.bf16.mxu0 %v2014_v15  ;;  %359 = vmatmul.mubr.f32.vlgmr.msra.gmra.mrb[0].mxu0 %v2072_v51  ;;  %v1309_v53 = vsub.f32 %v1230_v7, %v1308_v50 }
  0x4e   :  { %1806 = vmatpush1.bf16.msra.mxu0 %v2020_v20  ;;  %778 = vmatpush1.msra.mxu1 %v777_v62 }
  0x4f   :  { %1844 = vmatprep.subr.bf16.mxu1 %v1843_v43  ;;  %835 = vmatmul.mubr.f32.vlgmr.msra.gmra.mrb[2].mxu1 %v2053_v42  ;;  %v1310_v58 = vand.u32 4294901760, %v1309_v53 }
  0x50   :  { %1846 = vmatpush1.bf16.msra.mxu1 %v1845_v14  ;;  %1808 = vmatprep.subr.bf16.mxu0 %v2024_v22 }
  0x51   :  { %1848 = vmatprep.subr.bf16.mxu1 %v1847_v4  ;;  %439 = vmatprep.mubr.f32.mxu0 %v1971_v0 }
  0x52   :  { %1810 = vmatpush1.bf16.msra.mxu0 %v2031_v27  ;;  %925 = vmatprep.mubr.f32.mxu1 %v1971_v0 }
  0x53   :  { %382 = vmatprep.subr.mxu0 %v2039_v31  ;;  %1219 = vperm.xlu1 %1915, %v1215_v2  }
  0x54   :  { %1850 = vmatpush1.bf16.msra.mxu1 %v1849_v35 }
  0x55   :  { %867 = vmatprep.subr.mxu1 %v2185_v39 }
  0x56   :  { %384 = vmatpush1.msra.mxu0 %v2056_v45 }
  0x57   :  { %1812 = vmatprep.subr.bf16.mxu0 %v1811_v48  ;;  %443 = vmatmul.mubr.f32.vlgmr.msra.gmra.mrb[0].mxu0 %v2080_v59 }
  0x58   :  { %1814 = vmatpush1.bf16.msra.mxu0 %v1813_v54  ;;  %870 = vmatpush1.msra.mxu1 %v2159_v23 }
  0x59   :  { %1852 = vmatprep.subr.bf16.mxu1 %v2077_v55  ;;  %928 = vmatmul.mubr.f32.vlgmr.msra.gmra.mrb[2].mxu1 %v2072_v51 }
  0x5a   :  { %1854 = vmatpush1.bf16.msra.mxu1 %v2084_v1  ;;  %1816 = vmatprep.subr.bf16.mxu0 %v1815_v34 }
  0x5b   :  { %1856 = vmatprep.subr.bf16.mxu1 %v2112_v38  ;;  %543 = vmatprep.mubr.f32.mxu0 %v1971_v0 }
  0x5c   :  { %1818 = vmatpush1.bf16.msra.mxu0 %v1817_v16  ;;  %1008 = vmatprep.mubr.f32.mxu1 %v1971_v0 }
  0x5d   :  { %484 = vmatprep.subr.mxu0 %v200_v19  ;;  %1224 = vperm.xlu1 %1915, %v1216_v3   ;;  %v1311_v19 = vsub.f32 %v1309_v53, %v1310_v58 }
  0x5e   :  { %1858 = vmatpush1.bf16.msra.mxu1 %v2130_v57 }
  0x5f   :  { %951 = vmatprep.subr.mxu1 %v2138_v5 }
  0x60   :  { %488 = vmatpush1.msra.mxu0 %v2318_v28 }
  0x61   :  { %1820 = vmatprep.subr.bf16.mxu0 %v2014_v15  ;;  %545 = vmatmul.mubr.f32.vlgmr.msra.gmra.mrb[0].mxu0 %v2053_v42  ;;  %v2321_v15 = vand.u32 4294901760, %v2134_v61 }
  0x62   :  { %1822 = vmatpush1.bf16.msra.mxu0 %v2020_v20  ;;  %953 = vmatpush1.msra.mxu1 %v2142_v6 }
  0x63   :  { %1860 = vmatprep.subr.bf16.mxu1 %v1859_v26  ;;  %1012 = vmatmul.mubr.f32.vlgmr.msra.gmra.mrb[2].mxu1 %v2080_v59  ;;  %v1865_v37 = vpack.c.bf16 %v2321_v15, %v751_v13  ;;  %v1312_v13 = vand.u32 4294901760, %v1311_v19 }
  0x64   :  { %1862 = vmatpush1.bf16.msra.mxu1 %v1861_v32  ;;  %1824 = vmatprep.subr.bf16.mxu0 %v2024_v22 }
  0x65   :  { %1864 = vmatprep.subr.bf16.mxu1 %v1863_v36  ;;  %625 = vmatprep.mubr.f32.mxu0 %v1971_v0 }
  0x66   :  { %1826 = vmatpush1.bf16.msra.mxu0 %v2031_v27  ;;  %1112 = vmatprep.mubr.f32.mxu1 %v1971_v0 }
  0x67   :  { %568 = vmatprep.subr.mxu0 %v2039_v31 }
  0x68   :  { %1866 = vmatpush1.bf16.msra.mxu1 %v1865_v37 }
  0x69   :  { %1053 = vmatprep.subr.mxu1 %v769_v56 }
  0x6a   :  { %570 = vmatpush1.msra.mxu0 %v2056_v45 }
  0x6b   :  { %627 = vmatmul.mubr.f32.vlgmr.msra.gmra.mrb[0].mxu0 %v2053_v42 }
  0x6c   :  { %1057 = vmatpush1.msra.mxu1 %v775_v49 }
  0x6d   :  { %1868 = vmatprep.subr.bf16.mxu1 %v2077_v55  ;;  %1114 = vmatmul.mubr.f32.vlgmr.msra.gmra.mrb[2].mxu1 %v2053_v42 }
  0x6e   :  { %1870 = vmatpush1.bf16.msra.mxu1 %v2084_v1  ;;  %1194 = vmatprep.mubr.f32.mxu1 %v1971_v0 }
  0x6f   :  { %1872 = vmatprep.subr.bf16.mxu1 %v2112_v38 }
  0x72   :  { %1874 = vmatpush1.bf16.msra.mxu1 %v2130_v57 }
  0x73   :  { %1137 = vmatprep.subr.mxu1 %v2138_v5 }
  0x76   :  { %1139 = vmatpush1.msra.mxu1 %v2142_v6 }
  0x77   :  { %1196 = vmatmul.mubr.f32.vlgmr.msra.gmra.mrb[2].mxu1 %v2053_v42  ;;  %v1228_v42 = vsel %vm1227_vm1, %v1215_v2, 0 }
  0x78   :  { %v1298_v8 = vand.u32 4294901760, %v1228_v42 }
  0x7a   :  { %v1299_v10 = vsub.f32 %v1228_v42, %v1298_v8 }
  0x7c   :  { %v1300_v24 = vand.u32 4294901760, %v1299_v10 }
  0x7e   :  { %v1301_v38 = vsub.f32 %v1299_v10, %v1300_v24 }
  0x80   :  { %v1302_v46 = vand.u32 4294901760, %v1301_v38 }
  0x82   :  { %1751 = vmatprep.mubr.f32.mxu0 %v1302_v46 }
  0xd2   :  { %v1220_v56 = vpop.permute.xlu1 %1219 }
  0xdc   :  { %v1225_v11 = vpop.permute.xlu1 %1224 }
 0x10b   :  { %v145_v20 = vpop.f32.mrb[0].mxu1 }
 0x10c   :  { %v147_v22 = vpop.f32.mrb[1].mxu1 }
 0x13e   :  { %v628_v27 = vpop.f32.mrb[0].mxu0 }
 0x13f   :  { %v1875_v31 = vadd.f32 %v628_v27, %v145_v20  ;;  %v630_v40 = vpop.f32.mrb[1].mxu0 }
 0x140   :  { %v1876_v41 = vadd.f32 %v630_v40, %v147_v22 }
 0x141   :  { %v1202_v45 = vmax.f32 %v1875_v31, 0.0 }
 0x142   :  { %v1203_v51 = vmax.f32 %v1876_v41, 0.0 }
 0x144   :  { %v1206_v52 = vadd.f32 %v1203_v51, %v1202_v45 }
 0x146   :  { %1207 = vadd.xlane.f32.xlu0 %v1206_v52 }
 0x14a   :  { %v1197_v0 = vpop.f32.mrb[2].mxu1 }
 0x14b   :  { %v1204_v55 = vmax.f32 %v1197_v0, 0.0  ;;  %v1199_v59 = vpop.f32.mrb[3].mxu1 }
 0x14c   :  { %v1205_v60 = vmax.f32 %v1199_v59, 0.0 }
 0x14e   :  { %v1209_v1 = vadd.f32 %v1205_v60, %v1204_v55 }
 0x150   :  { %1210 = vadd.xlane.f32.xlu0 %v1209_v1 }
 0x1d3   :  { %v1208_v57 = vpop.xlane.xlu0 %1207 }
 0x1dd   :  { %v1211_v61 = vpop.xlane.xlu0 %1210 }
 0x1de   :  { %v1213_v63 = vsel %vm1212_vm2, %v1208_v57, %v1211_v61 }
 0x1df   :  { %v1214_v5 = vmul.f32 0.00390625, %v1213_v63 }
 0x1e1   :  { %v1233_v6 = vand.u32 4294901760, %v1214_v5 }
 0x1e3   :  { %v1320_v17 = vsub.f32 %v1214_v5, %v1233_v6  ;;  %1749 = vmatprep.subr.mxu0 %v1233_v6 }
 0x1e4   :  { %1750 = vmatpush3.msra.mxu0 %v1233_v6 }
 0x1e5   :  { %1752 = vmatmul.mubr.f32.vlgmr.msra.gmra.mrb[2].mxu0 %v1312_v13  ;;  %v1321_v23 = vand.u32 4294901760, %v1320_v17 }
 0x1e6   :  { %1756 = vmatprep.mubr.f32.mxu0 %v1298_v8 }
 0x1e7   :  { %v1322_v39 = vsub.f32 %v1320_v17, %v1321_v23 }
 0x1e9   :  { %v1323_v49 = vand.u32 4294901760, %v1322_v39 }
 0x1eb   :  { %1754 = vmatprep.subr.mxu0 %v1323_v49 }
 0x1ec   :  { %1755 = vmatpush3.msra.mxu0 %v1323_v49 }
 0x1ed   :  { %1757 = vmatmul.mubr.f32.vlgmr.msra.gmra.mrb[2].mxu0 %v1308_v50  ;;  %1759 = vmatprep.subr.mxu0 %v1320_v17 }
 0x1ee   :  { %1760 = vmatpush3.msra.mxu0 %v1320_v17  ;;  %1761 = vmatprep.mubr.f32.mxu0 %v1299_v10 }
 0x1ef   :  { %1764 = vmatprep.subr.mxu0 %v1233_v6 }
 0x1f5   :  { %1762 = vmatmul.mubr.f32.vlgmr.msra.gmra.mrb[2].mxu0 %v1309_v53 }
 0x1f6   :  { %1765 = vmatpush3.msra.mxu0 %v1233_v6  ;;  %1766 = vmatprep.mubr.f32.mxu0 %v1300_v24 }
 0x1f7   :  { %1769 = vmatprep.subr.mxu0 %v1321_v23 }
 0x1fd   :  { %1767 = vmatmul.mubr.f32.vlgmr.msra.gmra.mrb[2].mxu0 %v1310_v58 }
 0x1fe   :  { %1770 = vmatpush3.msra.mxu0 %v1321_v23  ;;  %1771 = vmatprep.mubr.f32.mxu0 %v1298_v8 }
 0x1ff   :  { %1774 = vmatprep.subr.mxu0 %v1233_v6 }
 0x205   :  { %1772 = vmatmul.mubr.f32.vlgmr.msra.gmra.mrb[2].mxu0 %v1308_v50 }
 0x206   :  { %1775 = vmatpush3.msra.mxu0 %v1233_v6  ;;  %1776 = vmatprep.mubr.f32.mxu0 %v1298_v8 }
 0x20d   :  { %1777 = vmatmul.mubr.f32.vlgmr.msra.gmra.mrb[2].mxu0 %v1308_v50 }
 0x2e0   :  { %v1778_v12 = vpop.f32.mrb[2].mxu0 }
 0x2e1   :  { %v1877_v9 = vadd.f32 %v1778_v12, %v1225_v11  ;;  %v1711_v18 = vpop.f32.mrb[3].mxu0 }
 0x2e2   :  { %v1878_v29 = vadd.f32 %v1711_v18, %v1220_v56 }
 0x2e3   :  { %1724 = vst.msk [vmem:[%s2309_s2 + $0x8] sm:$0x3] %vm1723_vm3, %v1877_v9 }
 0x2e4   :  { %1722 = vst.msk [vmem:[%s2309_s2] sm:$0xff] %vm1721_vm4, %v1878_v29 }
 0x2e5   :  { %1729 = vsyncpa [#allocation3], 1 }
 0x2e6   :  { %1730 = vsyncpa [#allocation5], 1 }

</bundles_post_ra>
